<compile_context>
chip_gen: v5e
topology: v5e:2x2
jax: 0.10.0
libtpu: 0.0.40
codegen_flags: <defaults>
</compile_context>

<pallas_src>
import jax
import jax.numpy as jnp
from jax.experimental import pallas as pl
from jax.experimental.pallas import tpu as pltpu


def _round_up(x, m):
    return ((x + m - 1) // m) * m


def _cdiv(a, b):
    return (a + b - 1) // b


def _vmem_capacity_bytes():
    try:
        return int(pltpu.get_tpu_info().vmem_capacity_bytes)
    except Exception:
        return 64 * 2**20  # conservative fallback (v7x per-TensorCore size)


def _select_tp(Pf, H, cd, budget):
    """Largest Pf tile whose weight tiles fit the budget (256-aligned first)."""
    if 2 * H * Pf * cd <= budget:
        return Pf                                  # fully resident -> kp == 1
    for align in (256, 128):
        if Pf % align:
            continue
        smallest = None
        for t in range(Pf - align, align - 1, -align):
            if Pf % t:
                continue
            if 2 * 2 * H * t * cd <= budget:       # double-buffered tiles
                return t                           # largest aligned fit
            smallest = t
        if smallest is not None:
            return smallest                        # nothing fits: minimize VMEM
    return Pf                                      # no aligned divisor; best effort


def _ffn_kernel_resident(x_ref, w1_ref, b1_ref, w2_ref, b2_ref, o_ref):
    # Fully-resident Pf: single fused MLP step, no accumulator round-trip.
    x = x_ref[...].astype(w1_ref.dtype)            # cast in-kernel (no extra HBM pass)
    h = jnp.dot(x, w1_ref[...], preferred_element_type=jnp.float32)
    h = jnp.maximum(h + b1_ref[...], 0.0)
    # TODO(synk): dropout is identity here (inference); training-mode dropout
    # would use pltpu.prng_seed + pltpu.stateful_bernoulli.
    y = jnp.dot(h.astype(w2_ref.dtype), w2_ref[...],
                preferred_element_type=jnp.float32)
    o_ref[...] = (y + b2_ref[...]).astype(o_ref.dtype)


def _ffn_kernel_tiled(x_ref, w1_ref, b1_ref, w2_ref, b2_ref, o_ref, acc_ref):
    # Pf tiled along grid axis 1 ("arbitrary"), f32 accumulator in VMEM.
    j = pl.program_id(1)

    @pl.when(j == 0)
    def _():
        acc_ref[...] = jnp.zeros_like(acc_ref)

    x = x_ref[...].astype(w1_ref.dtype)
    h = jnp.dot(x, w1_ref[...], preferred_element_type=jnp.float32)
    h = jnp.maximum(h + b1_ref[...], 0.0)
    acc_ref[...] += jnp.dot(h.astype(w2_ref.dtype), w2_ref[...],
                            preferred_element_type=jnp.float32)

    @pl.when(j == pl.num_programs(1) - 1)
    def _():
        o_ref[...] = (acc_ref[...] + b2_ref[...]).astype(o_ref.dtype)


def prepare_ffn_params(w1, b1, w2, b2, compute_dtype=jnp.bfloat16):
    """Pre-transpose / pre-cast Conv1d(k=1) params once (hoisted out of forward).

    w1: (pf, hid) = fc_1.weight (kernel dim squeezed), b1: (pf,)
    w2: (hid, pf) = fc_2.weight,                       b2: (hid,)
    """
    w1t = jnp.asarray(w1.T, dtype=compute_dtype)           # (hid, pf)
    w2t = jnp.asarray(w2.T, dtype=compute_dtype)           # (pf, hid)
    b1r = jnp.asarray(b1, dtype=jnp.float32).reshape(1, -1)
    b2r = jnp.asarray(b2, dtype=jnp.float32).reshape(1, -1)
    return w1t, b1r, w2t, b2r


def positionwise_feedforward_pretransposed(
        x, w1t, b1r, w2t, b2r, *, tm=256, tp=None, single_buffer_weights=True):
    """x: (B, S, hid). w1t: (hid, pf), b1r: (1, pf), w2t: (pf, hid), b2r: (1, hid)."""
    B, S, H = x.shape
    Hw, Pf = w1t.shape
    assert Hw == H and w2t.shape == (Pf, H)
    compute_dtype = w1t.dtype
    out_dtype = x.dtype
    cd = jnp.dtype(compute_dtype).itemsize
    xd = jnp.dtype(x.dtype).itemsize
    od = jnp.dtype(out_dtype).itemsize

    M = B * S
    vmem_cap = _vmem_capacity_bytes()
    weight_budget = int(0.35 * vmem_cap)   # ~45 MiB on 128 MiB parts, ~22 MiB on v7x

    # --- Pf tiling: keep resident weights inside a generation-aware budget ---
    if tp is None:
        tp = _select_tp(Pf, H, cd, weight_budget)
    else:
        if not (tp == Pf or (Pf % tp == 0 and tp % 128 == 0)):
            raise ValueError(
                f"tp={tp} must equal Pf={Pf} or be a 128-aligned divisor of Pf")
    kp = Pf // tp

    def vmem_need(tm_):
        wbuf = 1 if (kp == 1 and single_buffer_weights) else 2
        n = 2 * tm_ * H * xd                      # x tiles (double buffered)
        n += 2 * tm_ * H * od                     # out tiles
        n += 2 * wbuf * H * tp * cd               # W1^T + W2^T tiles
        n += 2 * (tp + H) * 4                     # biases
        n += tm_ * tp * 4 + tm_ * tp * cd         # h (f32) + bf16 cast copy
        n += tm_ * H * cd                         # x cast copy
        if kp > 1:
            n += tm_ * H * 4                      # f32 accumulator
        return n

    # --- row tiling (no padding; partial last block handled by Pallas) ------
    tm_eff = max(8, _round_up(min(tm, _round_up(M, 8)), 8))
    if kp > 1:
        # Weight tiles are re-streamed once per row tile; bigger tm halves that.
        for cand in (512, 1024):
            c = min(cand, _round_up(M, 8))
            if c > tm_eff and vmem_need(c) <= 0.6 * vmem_cap:
                tm_eff = c
    # Give the 'parallel' M axis >=2 steps so v7x's 2 TensorCores both work.
    if _cdiv(M, tm_eff) < 2 and M >= 512:
        tm_eff = max(256, _round_up(_cdiv(M, 2), 256))
    grid_m = _cdiv(M, tm_eff)

    x2d = x.reshape(M, H)   # metadata-only view; dtype cast happens in-kernel

    const_w = (dict(pipeline_mode=pl.Buffered(1))
               if (single_buffer_weights and kp == 1) else {})
    const_b2 = dict(pipeline_mode=pl.Buffered(1)) if single_buffer_weights else {}

    if kp == 1:
        in_specs = [
            pl.BlockSpec((tm_eff, H), lambda i: (i, 0)),              # x rows
            pl.BlockSpec((H, Pf), lambda i: (0, 0), **const_w),       # W1^T
            pl.BlockSpec((1, Pf), lambda i: (0, 0), **const_w),       # b1
            pl.BlockSpec((Pf, H), lambda i: (0, 0), **const_w),       # W2^T
            pl.BlockSpec((1, H), lambda i: (0, 0), **const_b2),       # b2
        ]
        out_spec = pl.BlockSpec((tm_eff, H), lambda i: (i, 0))
        grid = (grid_m,)
        scratch = []
        kernel = _ffn_kernel_resident
        dims = ("parallel",)
    else:
        in_specs = [
            pl.BlockSpec((tm_eff, H), lambda i, j: (i, 0)),           # x rows
            pl.BlockSpec((H, tp), lambda i, j: (0, j)),               # W1^T tile
            pl.BlockSpec((1, tp), lambda i, j: (0, j)),               # b1 tile
            pl.BlockSpec((tp, H), lambda i, j: (j, 0)),               # W2^T tile
            pl.BlockSpec((1, H), lambda i, j: (0, 0), **const_b2),    # b2
        ]
        out_spec = pl.BlockSpec((tm_eff, H), lambda i, j: (i, 0))
        grid = (grid_m, kp)
        scratch = [pltpu.VMEM((tm_eff, H), jnp.float32)]
        kernel = _ffn_kernel_tiled
        dims = ("parallel", "arbitrary")

    need = vmem_need(tm_eff)
    vmem_limit = int(min(int(0.75 * vmem_cap),
                         max(32 * 2**20, need + (8 << 20))))

    # Weight re-read traffic when Pf is tiled (re-streamed once per row tile).
    weight_bytes = 2 * H * Pf * cd * (grid_m if kp > 1 else 1)
    cost = pl.CostEstimate(
        flops=4 * M * H * Pf,
        transcendentals=0,
        bytes_accessed=int(M * H * (xd + od) + weight_bytes + (Pf + H) * 4))

    out2d = pl.pallas_call(
        kernel,
        out_shape=jax.ShapeDtypeStruct((M, H), out_dtype),
        grid_spec=pltpu.PrefetchScalarGridSpec(
            num_scalar_prefetch=0,
            grid=grid,
            in_specs=in_specs,
            out_specs=out_spec,
            scratch_shapes=scratch,
        ),
        compiler_params=pltpu.CompilerParams(
            dimension_semantics=dims,
            vmem_limit_bytes=vmem_limit),
        cost_estimate=cost,
    )(x2d, w1t, b1r, w2t, b2r)

    return out2d.reshape(B, S, H)


def positionwise_feedforward(x, w1, b1, w2, b2, *, tm=256, tp=None,
                             compute_dtype=jnp.bfloat16,
                             single_buffer_weights=True):
    """Convenience wrapper taking PyTorch-layout Conv1d(k=1) params.
    w1: (pf, hid), b1: (pf,), w2: (hid, pf), b2: (hid,)."""
    # TODO(synk): an fp8-weight path (fp8 W1/W2, bf16 activations) would halve
    # weight DMA/VMEM on v7x; not enabled here to keep numerics conservative.
    params = prepare_ffn_params(w1, b1, w2, b2, compute_dtype)
    return positionwise_feedforward_pretransposed(
        x, *params, tm=tm, tp=tp, single_buffer_weights=single_buffer_weights)


def _reference(x, w1, b1, w2, b2):
    # Pure-JAX reference of the PyTorch forward (inference, dropout = identity).
    h = jnp.maximum(jnp.einsum("bsh,ph->bsp", x, w1) + b1, 0.0)
    return jnp.einsum("bsp,hp->bsh", h, w2) + b2


if __name__ == "__main__":
    key = jax.random.PRNGKey(0)
    B, S, HID, PF = 2, 64, 128, 256   # hid_dim=128, pf_dim=256

    kx, k1, k2, k3, k4 = jax.random.split(key, 5)
    x = jax.random.normal(kx, (B, S, HID), dtype=jnp.float32)
    # Conv1d weights with kernel=1, squeezed: fc_1.weight -> (pf, hid),
    # fc_2.weight -> (hid, pf).
    w1 = jax.random.normal(k1, (PF, HID), dtype=jnp.float32) * 0.05
    b1 = jax.random.normal(k2, (PF,), dtype=jnp.float32) * 0.05
    w2 = jax.random.normal(k3, (HID, PF), dtype=jnp.float32) * 0.05
    b2 = jax.random.normal(k4, (HID,), dtype=jnp.float32) * 0.05

    ref = _reference(x, w1, b1, w2, b2)

    # Exact path (f32 compute, fully-resident weights) -- tight tolerance.
    out_f32 = jax.block_until_ready(
        positionwise_feedforward(x, w1, b1, w2, b2, compute_dtype=jnp.float32))
    assert out_f32.shape == (B, S, HID)
    assert jnp.allclose(out_f32, ref, atol=1e-4, rtol=1e-4), "f32 path mismatch"

    # Fast path (bf16 MXU operands, f32 accumulation) -- wider tolerance.
    out_bf16 = jax.block_until_ready(
        positionwise_feedforward(x, w1, b1, w2, b2, compute_dtype=jnp.bfloat16))
    assert out_bf16.shape == (B, S, HID)
    assert jnp.allclose(out_bf16, ref, atol=5e-2, rtol=5e-2), "bf16 path mismatch"

    # Forced Pf tiling (tp=128 -> kp=2) exercises the accumulator kernel.
    out_tp = jax.block_until_ready(
        positionwise_feedforward(x, w1, b1, w2, b2, tp=128,
                                 compute_dtype=jnp.float32))
    assert jnp.allclose(out_tp, ref, atol=1e-4, rtol=1e-4), "tiled-Pf mismatch"

    # Ragged row count (exercises the unpadded partial-block path).
    xr = jax.random.normal(kx, (3, 37, HID), dtype=jnp.float32)
    out_r = jax.block_until_ready(
        positionwise_feedforward(xr, w1, b1, w2, b2, compute_dtype=jnp.float32))
    assert out_r.shape == (3, 37, HID)
    assert jnp.allclose(out_r, _reference(xr, w1, b1, w2, b2),
                        atol=1e-4, rtol=1e-4), "ragged-M mismatch"

    print("KERNEL_OK")
</pallas_src>

<mosaic_0001>
module attributes {stable_mosaic.version = 11 : i64} {
  func.func @_ffn_kernel_resident(%arg0: i32, %arg1: memref<128x128xf32, #tpu.memory_space<vmem>>, %arg2: memref<128x256xf32, #tpu.memory_space<vmem>>, %arg3: memref<1x256xf32, #tpu.memory_space<vmem>>, %arg4: memref<256x128xf32, #tpu.memory_space<vmem>>, %arg5: memref<1x128xf32, #tpu.memory_space<vmem>>, %arg6: memref<128x128xf32, #tpu.memory_space<vmem>>) attributes {dimension_semantics = [#tpu.dimension_semantics<parallel>], iteration_bounds = array<i64: 1>, scalar_prefetch = 0 : i64, scratch_operands = 0 : i64, tpu.core_type = #tpu.core_type<tc>, window_params = [{transform_indices = @transform_0, window_bounds = array<i64: 128, 128>}, {pipeline_mode = #tpu.pipeline_mode<synchronous>, transform_indices = @transform_1, window_bounds = array<i64: 128, 256>}, {pipeline_mode = #tpu.pipeline_mode<synchronous>, transform_indices = @transform_2, window_bounds = array<i64: 1, 256>}, {pipeline_mode = #tpu.pipeline_mode<synchronous>, transform_indices = @transform_3, window_bounds = array<i64: 256, 128>}, {pipeline_mode = #tpu.pipeline_mode<synchronous>, transform_indices = @transform_4, window_bounds = array<i64: 1, 128>}, {transform_indices = @transform_5, window_bounds = array<i64: 128, 128>}]} {
    %c0 = arith.constant 0 : index
    %c0_0 = arith.constant 0 : index
    %0 = vector.load %arg1[%c0, %c0_0] : memref<128x128xf32, #tpu.memory_space<vmem>>, vector<128x128xf32>
    %c0_1 = arith.constant 0 : index
    %c0_2 = arith.constant 0 : index
    %1 = vector.load %arg2[%c0_1, %c0_2] : memref<128x256xf32, #tpu.memory_space<vmem>>, vector<128x256xf32>
    %cst = arith.constant dense<0.000000e+00> : vector<128x256xf32>
    %2 = tpu.matmul %0, %1, %cst {dimension_numbers = #tpu.dot_dimension_numbers<[1], [0], [0], [1], [0, 0, 1, 1], [], []>} : vector<128x128xf32>, vector<128x256xf32>, vector<128x256xf32> -> vector<128x256xf32>
    %c0_3 = arith.constant 0 : index
    %c0_4 = arith.constant 0 : index
    %3 = vector.load %arg3[%c0_3, %c0_4] : memref<1x256xf32, #tpu.memory_space<vmem>>, vector<1x256xf32>
    %4 = vector.broadcast %3 : vector<1x256xf32> to vector<128x256xf32>
    %5 = arith.addf %2, %4 : vector<128x256xf32>
    %cst_5 = arith.constant 0.000000e+00 : f32
    %6 = vector.broadcast %cst_5 : f32 to vector<128x256xf32>
    %7 = arith.maximumf %5, %6 : vector<128x256xf32>
    %c0_6 = arith.constant 0 : index
    %c0_7 = arith.constant 0 : index
    %8 = vector.load %arg4[%c0_6, %c0_7] : memref<256x128xf32, #tpu.memory_space<vmem>>, vector<256x128xf32>
    %cst_8 = arith.constant dense<0.000000e+00> : vector<128x128xf32>
    %9 = tpu.matmul %7, %8, %cst_8 {dimension_numbers = #tpu.dot_dimension_numbers<[1], [0], [0], [1], [0, 0, 1, 1], [], []>} : vector<128x256xf32>, vector<256x128xf32>, vector<128x128xf32> -> vector<128x128xf32>
    %c0_9 = arith.constant 0 : index
    %c0_10 = arith.constant 0 : index
    %10 = vector.load %arg5[%c0_9, %c0_10] : memref<1x128xf32, #tpu.memory_space<vmem>>, vector<1x128xf32>
    %11 = vector.broadcast %10 : vector<1x128xf32> to vector<128x128xf32>
    %12 = arith.addf %9, %11 : vector<128x128xf32>
    %c0_11 = arith.constant 0 : index
    %c0_12 = arith.constant 0 : index
    %13 = vector.load %arg6[%c0_11, %c0_12] : memref<128x128xf32, #tpu.memory_space<vmem>>, vector<128x128xf32>
    tpu.vector_store %arg6[%c0_11, %c0_12], %12 {strides = array<i32>} : memref<128x128xf32, #tpu.memory_space<vmem>>, vector<128x128xf32>,
    return
  }
  func.func @transform_0(%arg0: i32) -> (i32, i32) {
    %c0_i32 = arith.constant 0 : i32
    %c0_i32_0 = arith.constant 0 : i32
    return %arg0, %c0_i32 : i32, i32
  }
  func.func @transform_1(%arg0: i32) -> (i32, i32) {
    %c0_i32 = arith.constant 0 : i32
    %c0_i32_0 = arith.constant 0 : i32
    %c0_i32_1 = arith.constant 0 : i32
    return %c0_i32, %c0_i32_0 : i32, i32
  }
  func.func @transform_2(%arg0: i32) -> (i32, i32) {
    %c0_i32 = arith.constant 0 : i32
    %c0_i32_0 = arith.constant 0 : i32
    %c0_i32_1 = arith.constant 0 : i32
    return %c0_i32, %c0_i32_0 : i32, i32
  }
  func.func @transform_3(%arg0: i32) -> (i32, i32) {
    %c0_i32 = arith.constant 0 : i32
    %c0_i32_0 = arith.constant 0 : i32
    %c0_i32_1 = arith.constant 0 : i32
    return %c0_i32, %c0_i32_0 : i32, i32
  }
  func.func @transform_4(%arg0: i32) -> (i32, i32) {
    %c0_i32 = arith.constant 0 : i32
    %c0_i32_0 = arith.constant 0 : i32
    %c0_i32_1 = arith.constant 0 : i32
    return %c0_i32, %c0_i32_0 : i32, i32
  }
  func.func @transform_5(%arg0: i32) -> (i32, i32) {
    %c0_i32 = arith.constant 0 : i32
    %c0_i32_0 = arith.constant 0 : i32
    return %arg0, %c0_i32 : i32, i32
  }
}

</mosaic_0001>

<bundles_post_ra>
// kernel: tpu_custom_call.1
= control target key start
LH: loop header
LB: loop body
LE: loop exit
PB: predicated region body
PF: predicated region fallthrough
CT: control target
= control target key end

     0   :  { %10 = vsyncpa [#allocation3], 0  ;;  %s759_s0 = inlined_call_operand.hbm [shape: f32[128,128], index: 0, kind: input, shape index: {}]   ;;  %s760_s1 = inlined_call_operand.hbm [shape: f32[128,256], index: 1, kind: input, shape index: {}]   ;;  %s761_s2 = inlined_call_operand.hbm [shape: f32[1,256], index: 2, kind: input, shape index: {}]   ;;  %s762_s3 = inlined_call_operand.hbm [shape: f32[256,128], index: 3, kind: input, shape index: {}]   ;;  %s763_s4 = inlined_call_operand.vmem [shape: f32[1,128], index: 4, kind: input, shape index: {}]   ;;  %s764_s5 = inlined_call_operand.hbm [shape: f32[128,128], index: 5, kind: output, shape index: {}]  }
   0x1   :  { %11 = vsyncpa [#allocation6], 0 }
   0x2   :  { %12 = vsyncpa [#allocation9], 0  ;;  %s31_s20 = sshll.u32 %s760_s1, 4  ;;  %s32_s20 = int_to_ptr.hbm [resolvable:$true] %s31_s20 }
   0x3   :  { %13 = vsyncpa [#allocation4], 0  ;;  %s639_s21 = smov [#allocation5]   ;;  %s18_s25 = sshll.u32 %s759_s0, 4  ;;  %s19_s25 = int_to_ptr.hbm [resolvable:$true] %s18_s25 }
   0x4   :  { %s33_s22 = sshll.u32 %s639_s21, 4  ;;  %s640_s26 = smov 256   ;;  %s34_s22 = int_to_ptr.vmem [resolvable:$true] %s33_s22 }
   0x5   :  { %s641_s27 = smov 16   ;;  %s642_s28 = smov [#allocation2]  }
   0x6   :  { %39 = dma.hbm_to_vmem [thread:$0]  %s32_s20, 4096, %s34_s22, [#allocation6], %s640_s26, %s640_s26, %s641_s27  }
   0x7   :  { %s20_s29 = sshll.u32 %s642_s28, 4  ;;  %s643_s30 = smov 128   ;;  %s21_s29 = int_to_ptr.vmem [resolvable:$true] %s20_s29 }
   0x8   :  { %s644_s6 = smov 8   ;;  %s45_s8 = sshll.u32 %s761_s2, 4  ;;  %s46_s8 = int_to_ptr.hbm [resolvable:$true] %s45_s8 }
   0x9   :  { %26 = dma.hbm_to_vmem [thread:$0]  %s19_s25, 2048, %s21_s29, [#allocation3], %s643_s30, %s643_s30, %s644_s6  }
   0xa   :  { %s645_s9 = smov [#allocation7]   ;;  %s55_s12 = sshll.u32 %s762_s3, 4  ;;  %s56_s12 = int_to_ptr.hbm [resolvable:$true] %s55_s12 }
   0xb   :  { %s47_s0 = sshll.u32 %s645_s9, 4  ;;  %s646_s13 = smov [#allocation8]   ;;  %s48_s0 = int_to_ptr.vmem [resolvable:$true] %s47_s0 }
   0xc   :  { %50 = dma.hbm_to_vmem [thread:$0]  %s46_s8, 32, %s48_s0, [#allocation6]  }
   0xd   :  { %s57_s14 = sshll.u32 %s646_s13, 4  ;;  %s58_s14 = int_to_ptr.vmem [resolvable:$true] %s57_s14 }
   0xe   :  { %63 = dma.hbm_to_vmem [thread:$0]  %s56_s12, 4096, %s58_s14, [#allocation9], %s643_s30, %s643_s30, %s644_s6  }
   0xf   :  { %631 = dma.done.wait [#allocation3], 2048  }
  0x10   :  { %632 = vsyncadd [#allocation3], 4294965248 }
  0x11   :  { %633 = dma.done.wait [#allocation6], 4128  }
  0x12   :  { %634 = vsyncadd [#allocation6], 4294963168 }
  0x13   :  { %635 = dma.done.wait [#allocation9], 4096  }
  0x14   :  { %636 = vsyncadd [#allocation9], 4294963200  ;;  %v128_v0 = vld [vmem:[#allocation5 + $0xf0] sm:$0xff]  ;;  %v126_v1 = vld [vmem:[#allocation5 + $0xe0] sm:$0xff]  ;;  %s486_s18 = sshll.u32 %s764_s5, 4  ;;  %s487_s18 = int_to_ptr.hbm [resolvable:$true] %s486_s18 }
  0x15   :  { %v129_v2 = vld [vmem:[#allocation5 + $0xf8] sm:$0xff]  ;;  %136 = vmatpush.msra.mxu0 %v128_v0  ;;  %v127_v3 = vld [vmem:[#allocation5 + $0xe8] sm:$0xff]  ;;  %v124_v4 = vld [vmem:[#allocation5 + $0xd0] sm:$0xff] }
  0x16   :  { %201 = vmatpush.msra.mxu1 %v129_v2  ;;  %v125_v5 = vld [vmem:[#allocation5 + $0xd8] sm:$0xff]  ;;  %v122_v6 = vld [vmem:[#allocation5 + $0xc0] sm:$0xff]  ;;  %v123_v7 = vld [vmem:[#allocation5 + $0xc8] sm:$0xff] }
  0x17   :  { %137 = vmatpush.msra.mxu0 %v126_v1  ;;  %v120_v8 = vld [vmem:[#allocation5 + $0xb0] sm:$0xff]  ;;  %v121_v9 = vld [vmem:[#allocation5 + $0xb8] sm:$0xff]  ;;  %v118_v10 = vld [vmem:[#allocation5 + $0xa0] sm:$0xff] }
  0x18   :  { %202 = vmatpush.msra.mxu1 %v127_v3  ;;  %v119_v11 = vld [vmem:[#allocation5 + $0xa8] sm:$0xff]  ;;  %v116_v12 = vld [vmem:[#allocation5 + $0x90] sm:$0xff]  ;;  %v117_v13 = vld [vmem:[#allocation5 + $0x98] sm:$0xff] }
  0x19   :  { %138 = vmatpush.msra.mxu0 %v124_v4  ;;  %v114_v14 = vld [vmem:[#allocation5 + $0x80] sm:$0xff]  ;;  %v115_v15 = vld [vmem:[#allocation5 + $0x88] sm:$0xff]  ;;  %v112_v16 = vld [vmem:[#allocation5 + $0x70] sm:$0xff] }
  0x1a   :  { %203 = vmatpush.msra.mxu1 %v125_v5  ;;  %v113_v17 = vld [vmem:[#allocation5 + $0x78] sm:$0xff]  ;;  %v110_v18 = vld [vmem:[#allocation5 + $0x60] sm:$0xff]  ;;  %v111_v19 = vld [vmem:[#allocation5 + $0x68] sm:$0xff] }
  0x1b   :  { %139 = vmatpush.msra.mxu0 %v122_v6  ;;  %v108_v20 = vld [vmem:[#allocation5 + $0x50] sm:$0xff]  ;;  %v109_v21 = vld [vmem:[#allocation5 + $0x58] sm:$0xff]  ;;  %v106_v22 = vld [vmem:[#allocation5 + $0x40] sm:$0xff] }
  0x1c   :  { %204 = vmatpush.msra.mxu1 %v123_v7  ;;  %v107_v23 = vld [vmem:[#allocation5 + $0x48] sm:$0xff]  ;;  %v104_v24 = vld [vmem:[#allocation5 + $0x30] sm:$0xff]  ;;  %v105_v25 = vld [vmem:[#allocation5 + $0x38] sm:$0xff] }
  0x1d   :  { %140 = vmatpush.msra.mxu0 %v120_v8  ;;  %v102_v26 = vld [vmem:[#allocation5 + $0x20] sm:$0xff]  ;;  %v103_v27 = vld [vmem:[#allocation5 + $0x28] sm:$0xff]  ;;  %v100_v28 = vld [vmem:[#allocation5 + $0x10] sm:$0xff] }
  0x1e   :  { %205 = vmatpush.msra.mxu1 %v121_v9  ;;  %v101_v29 = vld [vmem:[#allocation5 + $0x18] sm:$0xff]  ;;  %v98_v30 = vld [vmem:[#allocation5] sm:$0xff]  ;;  %v99_v31 = vld [vmem:[#allocation5 + $0x8] sm:$0xff] }
  0x1f   :  { %141 = vmatpush.msra.mxu0 %v118_v10  ;;  %v82_v32 = vld [vmem:[#allocation2] sm:$0xff]  ;;  %v83_v33 = vld [vmem:[#allocation2 + $0x8] sm:$0xff]  ;;  %v84_v34 = vld [vmem:[#allocation2 + $0x10] sm:$0xff] }
  0x20   :  { %206 = vmatpush.msra.mxu1 %v119_v11  ;;  %v85_v35 = vld [vmem:[#allocation2 + $0x18] sm:$0xff]  ;;  %v86_v36 = vld [vmem:[#allocation2 + $0x20] sm:$0xff]  ;;  %v87_v37 = vld [vmem:[#allocation2 + $0x28] sm:$0xff] }
  0x21   :  { %142 = vmatpush.msra.mxu0 %v116_v12  ;;  %v88_v38 = vld [vmem:[#allocation2 + $0x30] sm:$0xff]  ;;  %v89_v39 = vld [vmem:[#allocation2 + $0x38] sm:$0xff]  ;;  %v90_v40 = vld [vmem:[#allocation2 + $0x40] sm:$0xff] }
  0x22   :  { %207 = vmatpush.msra.mxu1 %v117_v13  ;;  %v313_v41 = vld [vmem:[#allocation8 + $0x78] sm:$0xff]  ;;  %v312_v42 = vld [vmem:[#allocation8 + $0x70] sm:$0xff]  ;;  %v311_v45 = vld [vmem:[#allocation8 + $0x68] sm:$0xff] }
  0x23   :  { %143 = vmatpush.msra.mxu0 %v114_v14  ;;  %v329_v43 = vld [vmem:[#allocation8 + $0xf8] sm:$0xff]  ;;  %334 = vmatpush.msra.mxu2 %v313_v41  ;;  %v328_v44 = vld [vmem:[#allocation8 + $0xf0] sm:$0xff]  ;;  %v91_v46 = vld [vmem:[#allocation2 + $0x48] sm:$0xff] }
  0x24   :  { %208 = vmatpush.msra.mxu1 %v115_v15  ;;  %399 = vmatpush.msra.mxu3 %v329_v43  ;;  %v310_v47 = vld [vmem:[#allocation8 + $0x60] sm:$0xff]  ;;  %v327_v48 = vld [vmem:[#allocation8 + $0xe8] sm:$0xff]  ;;  %v309_v49 = vld [vmem:[#allocation8 + $0x58] sm:$0xff] }
  0x25   :  { %144 = vmatpush.msra.mxu0 %v112_v16  ;;  %335 = vmatpush.msra.mxu2 %v312_v42  ;;  %v326_v50 = vld [vmem:[#allocation8 + $0xe0] sm:$0xff]  ;;  %v308_v51 = vld [vmem:[#allocation8 + $0x50] sm:$0xff]  ;;  %v325_v52 = vld [vmem:[#allocation8 + $0xd8] sm:$0xff] }
  0x26   :  { %209 = vmatpush.msra.mxu1 %v113_v17  ;;  %400 = vmatpush.msra.mxu3 %v328_v44  ;;  %v307_v53 = vld [vmem:[#allocation8 + $0x48] sm:$0xff]  ;;  %v324_v54 = vld [vmem:[#allocation8 + $0xd0] sm:$0xff]  ;;  %v306_v56 = vld [vmem:[#allocation8 + $0x40] sm:$0xff] }
  0x27   :  { %145 = vmatpush.msra.mxu0 %v110_v18  ;;  %336 = vmatpush.msra.mxu2 %v311_v45  ;;  %v92_v55 = vld [vmem:[#allocation2 + $0x50] sm:$0xff]  ;;  %v305_v58 = vld [vmem:[#allocation8 + $0x38] sm:$0xff]  ;;  %v322_v59 = vld [vmem:[#allocation8 + $0xc0] sm:$0xff] }
  0x28   :  { %210 = vmatpush.msra.mxu1 %v111_v19  ;;  %401 = vmatpush.msra.mxu3 %v327_v48  ;;  %v323_v57 = vld [vmem:[#allocation8 + $0xc8] sm:$0xff]  ;;  %v304_v60 = vld [vmem:[#allocation8 + $0x30] sm:$0xff]  ;;  %v321_v61 = vld [vmem:[#allocation8 + $0xb8] sm:$0xff] }
  0x29   :  { %146 = vmatpush.msra.mxu0 %v108_v20  ;;  %337 = vmatpush.msra.mxu2 %v310_v47  ;;  %v303_v62 = vld [vmem:[#allocation8 + $0x28] sm:$0xff]  ;;  %v320_v63 = vld [vmem:[#allocation8 + $0xb0] sm:$0xff]  ;;  %v302_v1 = vld [vmem:[#allocation8 + $0x20] sm:$0xff] }
  0x2a   :  { %211 = vmatpush.msra.mxu1 %v109_v21  ;;  %402 = vmatpush.msra.mxu3 %v326_v50  ;;  %v93_v0 = vld [vmem:[#allocation2 + $0x58] sm:$0xff]  ;;  %v319_v2 = vld [vmem:[#allocation8 + $0xa8] sm:$0xff]  ;;  %v318_v4 = vld [vmem:[#allocation8 + $0xa0] sm:$0xff] }
  0x2b   :  { %147 = vmatpush.msra.mxu0 %v106_v22  ;;  %338 = vmatpush.msra.mxu2 %v309_v49  ;;  %v301_v3 = vld [vmem:[#allocation8 + $0x18] sm:$0xff]  ;;  %v300_v5 = vld [vmem:[#allocation8 + $0x10] sm:$0xff]  ;;  %v299_v8 = vld [vmem:[#allocation8 + $0x8] sm:$0xff] }
  0x2c   :  { %212 = vmatpush.msra.mxu1 %v107_v23  ;;  %403 = vmatpush.msra.mxu3 %v325_v52  ;;  %v317_v6 = vld [vmem:[#allocation8 + $0x98] sm:$0xff]  ;;  %v316_v9 = vld [vmem:[#allocation8 + $0x90] sm:$0xff]  ;;  %v298_v10 = vld [vmem:[#allocation8] sm:$0xff] }
  0x2d   :  { %148 = vmatpush.msra.mxu0 %v104_v24  ;;  %339 = vmatpush.msra.mxu2 %v308_v51  ;;  %v94_v7 = vld [vmem:[#allocation2 + $0x60] sm:$0xff]  ;;  %v315_v11 = vld [vmem:[#allocation8 + $0x88] sm:$0xff]  ;;  %v97_v15 = vld [vmem:[#allocation2 + $0x78] sm:$0xff] }
  0x2e   :  { %213 = vmatpush.msra.mxu1 %v105_v25  ;;  %404 = vmatpush.msra.mxu3 %v324_v54  ;;  %v314_v12 = vld [vmem:[#allocation8 + $0x80] sm:$0xff]  ;;  %v96_v14 = vld [vmem:[#allocation2 + $0x70] sm:$0xff]  ;;  %v130_v16 = vld [vmem:[#allocation7] sm:$0x3] }
  0x2f   :  { %149 = vmatpush.msra.mxu0 %v102_v26  ;;  %340 = vmatpush.msra.mxu2 %v307_v53  ;;  %v95_v13 = vld [vmem:[#allocation2 + $0x68] sm:$0xff]  ;;  %v696_v17 = vperm.slane %v130_v16, 0  ;;  %v698_v18 = vperm.slane %v130_v16, 1 }
  0x30   :  { %214 = vmatpush.msra.mxu1 %v103_v27  ;;  %405 = vmatpush.msra.mxu3 %v323_v57 }
  0x31   :  { %150 = vmatpush.msra.mxu0 %v100_v28  ;;  %341 = vmatpush.msra.mxu2 %v306_v56 }
  0x32   :  { %215 = vmatpush.msra.mxu1 %v101_v29  ;;  %406 = vmatpush.msra.mxu3 %v322_v59 }
  0x33   :  { %151 = vmatpush.msra.mxu0 %v98_v30  ;;  %342 = vmatpush.msra.mxu2 %v305_v58 }
  0x34   :  { %216 = vmatpush.msra.mxu1 %v99_v31  ;;  %152 = vmatmul.f32.vlgmr.msra.gmra.mxu0 %v82_v32 }
  0x35   :  { %217 = vmatmul.f32.vlgmr.msra.gmra.mxu1 %v82_v32  ;;  %343 = vmatpush.msra.mxu2 %v304_v60 }
  0x36   :  { %407 = vmatpush.msra.mxu3 %v321_v61 }
  0x37   :  { %344 = vmatpush.msra.mxu2 %v303_v62 }
  0x38   :  { %408 = vmatpush.msra.mxu3 %v320_v63 }
  0x39   :  { %345 = vmatpush.msra.mxu2 %v302_v1 }
  0x3a   :  { %409 = vmatpush.msra.mxu3 %v319_v2 }
  0x3b   :  { %346 = vmatpush.msra.mxu2 %v301_v3 }
  0x3c   :  { %155 = vmatmul.f32.gmra.mxu0 %v83_v33  ;;  %410 = vmatpush.msra.mxu3 %v318_v4 }
  0x3d   :  { %220 = vmatmul.f32.gmra.mxu1 %v83_v33  ;;  %347 = vmatpush.msra.mxu2 %v300_v5 }
  0x3e   :  { %411 = vmatpush.msra.mxu3 %v317_v6 }
  0x3f   :  { %348 = vmatpush.msra.mxu2 %v299_v8 }
  0x40   :  { %412 = vmatpush.msra.mxu3 %v316_v9 }
  0x41   :  { %349 = vmatpush.msra.mxu2 %v298_v10 }
  0x42   :  { %413 = vmatpush.msra.mxu3 %v315_v11 }
  0x44   :  { %158 = vmatmul.f32.gmra.mxu0 %v84_v34  ;;  %414 = vmatpush.msra.mxu3 %v314_v12 }
  0x45   :  { %223 = vmatmul.f32.gmra.mxu1 %v84_v34 }
  0x4c   :  { %161 = vmatmul.f32.gmra.mxu0 %v85_v35 }
  0x4d   :  { %226 = vmatmul.f32.gmra.mxu1 %v85_v35 }
  0x54   :  { %164 = vmatmul.f32.gmra.mxu0 %v86_v36 }
  0x55   :  { %229 = vmatmul.f32.gmra.mxu1 %v86_v36 }
  0x5c   :  { %167 = vmatmul.f32.gmra.mxu0 %v87_v37 }
  0x5d   :  { %232 = vmatmul.f32.gmra.mxu1 %v87_v37 }
  0x64   :  { %170 = vmatmul.f32.gmra.mxu0 %v88_v38 }
  0x65   :  { %235 = vmatmul.f32.gmra.mxu1 %v88_v38 }
  0x6c   :  { %173 = vmatmul.f32.gmra.mxu0 %v89_v39 }
  0x6d   :  { %238 = vmatmul.f32.gmra.mxu1 %v89_v39 }
  0x74   :  { %176 = vmatmul.f32.gmra.mxu0 %v90_v40 }
  0x75   :  { %241 = vmatmul.f32.gmra.mxu1 %v90_v40 }
  0x7c   :  { %179 = vmatmul.f32.gmra.mxu0 %v91_v46 }
  0x7d   :  { %244 = vmatmul.f32.gmra.mxu1 %v91_v46 }
  0x84   :  { %182 = vmatmul.f32.gmra.mxu0 %v92_v55 }
  0x85   :  { %247 = vmatmul.f32.gmra.mxu1 %v92_v55 }
  0x8c   :  { %185 = vmatmul.f32.gmra.mxu0 %v93_v0 }
  0x8d   :  { %250 = vmatmul.f32.gmra.mxu1 %v93_v0 }
  0x94   :  { %188 = vmatmul.f32.gmra.mxu0 %v94_v7 }
  0x95   :  { %253 = vmatmul.f32.gmra.mxu1 %v94_v7 }
  0x9c   :  { %191 = vmatmul.f32.gmra.mxu0 %v95_v13 }
  0x9d   :  { %256 = vmatmul.f32.gmra.mxu1 %v95_v13 }
  0xa4   :  { %194 = vmatmul.f32.gmra.mxu0 %v96_v14 }
  0xa5   :  { %259 = vmatmul.f32.gmra.mxu1 %v96_v14 }
  0xac   :  { %197 = vmatmul.f32.gmra.mxu0 %v97_v15 }
  0xad   :  { %262 = vmatmul.f32.gmra.mxu1 %v97_v15 }
  0xb1   :  { %v153_v19 = vpop.f32.mrf.mxu0 }
  0xb2   :  { %v218_v20 = vpop.f32.mrf.mxu1  ;;  %v154_v21 = vadd.f32 %v153_v19, %v696_v17 }
  0xb3   :  { %v219_v22 = vadd.f32 %v218_v20, %v698_v18 }
  0xb4   :  { %v266_v23 = vmax.f32 %v154_v21, 0.0 }
  0xb5   :  { %v267_v24 = vmax.f32 %v219_v22, 0.0 }
  0xb6   :  { %350 = vmatmul.f32.vlgmr.msra.gmra.mxu2 %v266_v23 }
  0xb7   :  { %415 = vmatmul.f32.vlgmr.msra.gmra.mxu3 %v267_v24 }
  0xb9   :  { %v156_v25 = vpop.f32.mrf.mxu0 }
  0xba   :  { %v221_v26 = vpop.f32.mrf.mxu1  ;;  %v157_v27 = vadd.f32 %v156_v25, %v696_v17 }
  0xbb   :  { %v222_v28 = vadd.f32 %v221_v26, %v698_v18 }
  0xbc   :  { %v268_v29 = vmax.f32 %v157_v27, 0.0 }
  0xbd   :  { %v269_v30 = vmax.f32 %v222_v28, 0.0 }
  0xbe   :  { %353 = vmatmul.f32.gmra.mxu2 %v268_v29 }
  0xbf   :  { %418 = vmatmul.f32.gmra.mxu3 %v269_v30 }
  0xc1   :  { %v159_v31 = vpop.f32.mrf.mxu0 }
  0xc2   :  { %v224_v32 = vpop.f32.mrf.mxu1  ;;  %v160_v33 = vadd.f32 %v159_v31, %v696_v17 }
  0xc3   :  { %v225_v34 = vadd.f32 %v224_v32, %v698_v18 }
  0xc4   :  { %v270_v35 = vmax.f32 %v160_v33, 0.0 }
  0xc5   :  { %v271_v36 = vmax.f32 %v225_v34, 0.0 }
  0xc6   :  { %356 = vmatmul.f32.gmra.mxu2 %v270_v35 }
  0xc7   :  { %421 = vmatmul.f32.gmra.mxu3 %v271_v36 }
  0xc9   :  { %v162_v37 = vpop.f32.mrf.mxu0 }
  0xca   :  { %v227_v38 = vpop.f32.mrf.mxu1  ;;  %v163_v39 = vadd.f32 %v162_v37, %v696_v17 }
  0xcb   :  { %v228_v40 = vadd.f32 %v227_v38, %v698_v18 }
  0xcc   :  { %v272_v41 = vmax.f32 %v163_v39, 0.0 }
  0xcd   :  { %v273_v42 = vmax.f32 %v228_v40, 0.0 }
  0xce   :  { %359 = vmatmul.f32.gmra.mxu2 %v272_v41 }
  0xcf   :  { %424 = vmatmul.f32.gmra.mxu3 %v273_v42 }
  0xd1   :  { %v165_v43 = vpop.f32.mrf.mxu0 }
  0xd2   :  { %v230_v44 = vpop.f32.mrf.mxu1  ;;  %v166_v45 = vadd.f32 %v165_v43, %v696_v17 }
  0xd3   :  { %v231_v46 = vadd.f32 %v230_v44, %v698_v18 }
  0xd4   :  { %v274_v47 = vmax.f32 %v166_v45, 0.0 }
  0xd5   :  { %v275_v48 = vmax.f32 %v231_v46, 0.0 }
  0xd6   :  { %362 = vmatmul.f32.gmra.mxu2 %v274_v47 }
  0xd7   :  { %427 = vmatmul.f32.gmra.mxu3 %v275_v48 }
  0xd9   :  { %v168_v49 = vpop.f32.mrf.mxu0 }
  0xda   :  { %v233_v50 = vpop.f32.mrf.mxu1  ;;  %v169_v51 = vadd.f32 %v168_v49, %v696_v17 }
  0xdb   :  { %v234_v52 = vadd.f32 %v233_v50, %v698_v18 }
  0xdc   :  { %v276_v53 = vmax.f32 %v169_v51, 0.0 }
  0xdd   :  { %v277_v54 = vmax.f32 %v234_v52, 0.0 }
  0xde   :  { %365 = vmatmul.f32.gmra.mxu2 %v276_v53  ;;  %v735_v53 = vld [vmem:[%s763_s4] ss:$0 sm:$0xff]  ;;  %s647_s4 = smov [#allocation10]  }
  0xdf   :  { %430 = vmatmul.f32.gmra.mxu3 %v277_v54  ;;  %s484_s15 = sshll.u32 %s647_s4, 4  ;;  %s485_s15 = int_to_ptr.vmem [resolvable:$true] %s484_s15 }
  0xe1   :  { %v171_v55 = vpop.f32.mrf.mxu0 }
  0xe2   :  { %v236_v56 = vpop.f32.mrf.mxu1  ;;  %v172_v57 = vadd.f32 %v171_v55, %v696_v17 }
  0xe3   :  { %v237_v58 = vadd.f32 %v236_v56, %v698_v18 }
  0xe4   :  { %v278_v59 = vmax.f32 %v172_v57, 0.0 }
  0xe5   :  { %v279_v60 = vmax.f32 %v237_v58, 0.0 }
  0xe6   :  { %368 = vmatmul.f32.gmra.mxu2 %v278_v59 }
  0xe7   :  { %433 = vmatmul.f32.gmra.mxu3 %v279_v60 }
  0xe9   :  { %v174_v61 = vpop.f32.mrf.mxu0 }
  0xea   :  { %v239_v62 = vpop.f32.mrf.mxu1  ;;  %v175_v63 = vadd.f32 %v174_v61, %v696_v17 }
  0xeb   :  { %v240_v0 = vadd.f32 %v239_v62, %v698_v18 }
  0xec   :  { %v280_v1 = vmax.f32 %v175_v63, 0.0 }
  0xed   :  { %v281_v2 = vmax.f32 %v240_v0, 0.0 }
  0xee   :  { %371 = vmatmul.f32.gmra.mxu2 %v280_v1 }
  0xef   :  { %436 = vmatmul.f32.gmra.mxu3 %v281_v2 }
  0xf1   :  { %v177_v3 = vpop.f32.mrf.mxu0 }
  0xf2   :  { %v242_v4 = vpop.f32.mrf.mxu1  ;;  %v178_v5 = vadd.f32 %v177_v3, %v696_v17 }
  0xf3   :  { %v243_v6 = vadd.f32 %v242_v4, %v698_v18 }
  0xf4   :  { %v282_v7 = vmax.f32 %v178_v5, 0.0 }
  0xf5   :  { %v283_v8 = vmax.f32 %v243_v6, 0.0 }
  0xf6   :  { %374 = vmatmul.f32.gmra.mxu2 %v282_v7 }
  0xf7   :  { %439 = vmatmul.f32.gmra.mxu3 %v283_v8 }
  0xf9   :  { %v180_v9 = vpop.f32.mrf.mxu0 }
  0xfa   :  { %v245_v10 = vpop.f32.mrf.mxu1  ;;  %v181_v11 = vadd.f32 %v180_v9, %v696_v17 }
  0xfb   :  { %v246_v12 = vadd.f32 %v245_v10, %v698_v18 }
  0xfc   :  { %v284_v13 = vmax.f32 %v181_v11, 0.0 }
  0xfd   :  { %v285_v14 = vmax.f32 %v246_v12, 0.0 }
  0xfe   :  { %377 = vmatmul.f32.gmra.mxu2 %v284_v13 }
  0xff   :  { %442 = vmatmul.f32.gmra.mxu3 %v285_v14 }
 0x101   :  { %v183_v15 = vpop.f32.mrf.mxu0 }
 0x102   :  { %v248_v16 = vpop.f32.mrf.mxu1  ;;  %v184_v19 = vadd.f32 %v183_v15, %v696_v17 }
 0x103   :  { %v249_v20 = vadd.f32 %v248_v16, %v698_v18 }
 0x104   :  { %v286_v21 = vmax.f32 %v184_v19, 0.0 }
 0x105   :  { %v287_v22 = vmax.f32 %v249_v20, 0.0 }
 0x106   :  { %380 = vmatmul.f32.gmra.mxu2 %v286_v21 }
 0x107   :  { %445 = vmatmul.f32.gmra.mxu3 %v287_v22 }
 0x109   :  { %v186_v23 = vpop.f32.mrf.mxu0 }
 0x10a   :  { %v251_v24 = vpop.f32.mrf.mxu1  ;;  %v187_v25 = vadd.f32 %v186_v23, %v696_v17 }
 0x10b   :  { %v252_v26 = vadd.f32 %v251_v24, %v698_v18 }
 0x10c   :  { %v288_v27 = vmax.f32 %v187_v25, 0.0 }
 0x10d   :  { %v289_v28 = vmax.f32 %v252_v26, 0.0 }
 0x10e   :  { %383 = vmatmul.f32.gmra.mxu2 %v288_v27 }
 0x10f   :  { %448 = vmatmul.f32.gmra.mxu3 %v289_v28 }
 0x111   :  { %v189_v29 = vpop.f32.mrf.mxu0 }
 0x112   :  { %v254_v30 = vpop.f32.mrf.mxu1  ;;  %v190_v31 = vadd.f32 %v189_v29, %v696_v17 }
 0x113   :  { %v255_v32 = vadd.f32 %v254_v30, %v698_v18 }
 0x114   :  { %v290_v33 = vmax.f32 %v190_v31, 0.0 }
 0x115   :  { %v291_v34 = vmax.f32 %v255_v32, 0.0 }
 0x116   :  { %386 = vmatmul.f32.gmra.mxu2 %v290_v33 }
 0x117   :  { %451 = vmatmul.f32.gmra.mxu3 %v291_v34 }
 0x119   :  { %v192_v35 = vpop.f32.mrf.mxu0 }
 0x11a   :  { %v257_v36 = vpop.f32.mrf.mxu1  ;;  %v193_v37 = vadd.f32 %v192_v35, %v696_v17 }
 0x11b   :  { %v258_v38 = vadd.f32 %v257_v36, %v698_v18 }
 0x11c   :  { %v292_v39 = vmax.f32 %v193_v37, 0.0 }
 0x11d   :  { %v293_v40 = vmax.f32 %v258_v38, 0.0 }
 0x11e   :  { %389 = vmatmul.f32.gmra.mxu2 %v292_v39 }
 0x11f   :  { %454 = vmatmul.f32.gmra.mxu3 %v293_v40 }
 0x121   :  { %v195_v41 = vpop.f32.mrf.mxu0 }
 0x122   :  { %v260_v42 = vpop.f32.mrf.mxu1  ;;  %v196_v43 = vadd.f32 %v195_v41, %v696_v17 }
 0x123   :  { %v261_v44 = vadd.f32 %v260_v42, %v698_v18 }
 0x124   :  { %v294_v45 = vmax.f32 %v196_v43, 0.0 }
 0x125   :  { %v295_v46 = vmax.f32 %v261_v44, 0.0 }
 0x126   :  { %392 = vmatmul.f32.gmra.mxu2 %v294_v45 }
 0x127   :  { %457 = vmatmul.f32.gmra.mxu3 %v295_v46 }
 0x129   :  { %v198_v47 = vpop.f32.mrf.mxu0 }
 0x12a   :  { %v263_v48 = vpop.f32.mrf.mxu1  ;;  %v199_v49 = vadd.f32 %v198_v47, %v696_v17 }
 0x12b   :  { %v264_v50 = vadd.f32 %v263_v48, %v698_v18 }
 0x12c   :  { %v296_v51 = vmax.f32 %v199_v49, 0.0 }
 0x12d   :  { %v297_v52 = vmax.f32 %v264_v50, 0.0 }
 0x12e   :  { %395 = vmatmul.f32.gmra.mxu2 %v296_v51 }
 0x12f   :  { %460 = vmatmul.f32.gmra.mxu3 %v297_v52 }
 0x139   :  { %v351_v54 = vpop.f32.mrf.mxu2 }
 0x13a   :  { %v416_v55 = vpop.f32.mrf.mxu3  ;;  %v352_v56 = vadd.f32 %v735_v53, %v351_v54 }
 0x13c   :  { %v417_v57 = vadd.f32 %v416_v55, %v352_v56 }
 0x13e   :  { %464 = vst [vmem:[#allocation10] sm:$0xff] %v417_v57 }
 0x141   :  { %v354_v58 = vpop.f32.mrf.mxu2 }
 0x142   :  { %v419_v59 = vpop.f32.mrf.mxu3  ;;  %v355_v17 = vadd.f32 %v735_v53, %v354_v58 }
 0x144   :  { %v420_v18 = vadd.f32 %v419_v59, %v355_v17 }
 0x146   :  { %465 = vst [vmem:[#allocation10 + $0x8] sm:$0xff] %v420_v18 }
 0x149   :  { %v357_v60 = vpop.f32.mrf.mxu2 }
 0x14a   :  { %v422_v61 = vpop.f32.mrf.mxu3  ;;  %v358_v62 = vadd.f32 %v735_v53, %v357_v60 }
 0x14c   :  { %v423_v63 = vadd.f32 %v422_v61, %v358_v62 }
 0x14e   :  { %466 = vst [vmem:[#allocation10 + $0x10] sm:$0xff] %v423_v63 }
 0x151   :  { %v360_v0 = vpop.f32.mrf.mxu2 }
 0x152   :  { %v425_v1 = vpop.f32.mrf.mxu3  ;;  %v361_v2 = vadd.f32 %v735_v53, %v360_v0 }
 0x154   :  { %v426_v3 = vadd.f32 %v425_v1, %v361_v2 }
 0x156   :  { %467 = vst [vmem:[#allocation10 + $0x18] sm:$0xff] %v426_v3 }
 0x159   :  { %v363_v4 = vpop.f32.mrf.mxu2 }
 0x15a   :  { %v428_v5 = vpop.f32.mrf.mxu3  ;;  %v364_v6 = vadd.f32 %v735_v53, %v363_v4 }
 0x15c   :  { %v429_v7 = vadd.f32 %v428_v5, %v364_v6 }
 0x15e   :  { %468 = vst [vmem:[#allocation10 + $0x20] sm:$0xff] %v429_v7 }
 0x161   :  { %v366_v8 = vpop.f32.mrf.mxu2 }
 0x162   :  { %v431_v9 = vpop.f32.mrf.mxu3  ;;  %v367_v10 = vadd.f32 %v735_v53, %v366_v8 }
 0x164   :  { %v432_v11 = vadd.f32 %v431_v9, %v367_v10 }
 0x166   :  { %469 = vst [vmem:[#allocation10 + $0x28] sm:$0xff] %v432_v11 }
 0x169   :  { %v369_v12 = vpop.f32.mrf.mxu2 }
 0x16a   :  { %v434_v13 = vpop.f32.mrf.mxu3  ;;  %v370_v14 = vadd.f32 %v735_v53, %v369_v12 }
 0x16c   :  { %v435_v15 = vadd.f32 %v434_v13, %v370_v14 }
 0x16e   :  { %470 = vst [vmem:[#allocation10 + $0x30] sm:$0xff] %v435_v15 }
 0x171   :  { %v372_v16 = vpop.f32.mrf.mxu2 }
 0x172   :  { %v437_v19 = vpop.f32.mrf.mxu3  ;;  %v373_v20 = vadd.f32 %v735_v53, %v372_v16 }
 0x174   :  { %v438_v21 = vadd.f32 %v437_v19, %v373_v20 }
 0x176   :  { %471 = vst [vmem:[#allocation10 + $0x38] sm:$0xff] %v438_v21 }
 0x179   :  { %v375_v22 = vpop.f32.mrf.mxu2 }
 0x17a   :  { %v440_v23 = vpop.f32.mrf.mxu3  ;;  %v376_v24 = vadd.f32 %v735_v53, %v375_v22 }
 0x17c   :  { %v441_v25 = vadd.f32 %v440_v23, %v376_v24 }
 0x17e   :  { %472 = vst [vmem:[#allocation10 + $0x40] sm:$0xff] %v441_v25 }
 0x181   :  { %v378_v26 = vpop.f32.mrf.mxu2 }
 0x182   :  { %v443_v27 = vpop.f32.mrf.mxu3  ;;  %v379_v28 = vadd.f32 %v735_v53, %v378_v26 }
 0x184   :  { %v444_v29 = vadd.f32 %v443_v27, %v379_v28 }
 0x186   :  { %473 = vst [vmem:[#allocation10 + $0x48] sm:$0xff] %v444_v29 }
 0x189   :  { %v381_v30 = vpop.f32.mrf.mxu2 }
 0x18a   :  { %v446_v31 = vpop.f32.mrf.mxu3  ;;  %v382_v32 = vadd.f32 %v735_v53, %v381_v30 }
 0x18c   :  { %v447_v33 = vadd.f32 %v446_v31, %v382_v32 }
 0x18e   :  { %474 = vst [vmem:[#allocation10 + $0x50] sm:$0xff] %v447_v33 }
 0x191   :  { %v384_v34 = vpop.f32.mrf.mxu2 }
 0x192   :  { %v449_v35 = vpop.f32.mrf.mxu3  ;;  %v385_v36 = vadd.f32 %v735_v53, %v384_v34 }
 0x194   :  { %v450_v37 = vadd.f32 %v449_v35, %v385_v36 }
 0x196   :  { %475 = vst [vmem:[#allocation10 + $0x58] sm:$0xff] %v450_v37 }
 0x199   :  { %v387_v38 = vpop.f32.mrf.mxu2 }
 0x19a   :  { %v452_v39 = vpop.f32.mrf.mxu3  ;;  %v388_v40 = vadd.f32 %v735_v53, %v387_v38 }
 0x19c   :  { %v453_v41 = vadd.f32 %v452_v39, %v388_v40 }
 0x19e   :  { %476 = vst [vmem:[#allocation10 + $0x60] sm:$0xff] %v453_v41 }
 0x1a1   :  { %v390_v42 = vpop.f32.mrf.mxu2 }
 0x1a2   :  { %v455_v43 = vpop.f32.mrf.mxu3  ;;  %v391_v44 = vadd.f32 %v735_v53, %v390_v42 }
 0x1a4   :  { %v456_v45 = vadd.f32 %v455_v43, %v391_v44 }
 0x1a6   :  { %477 = vst [vmem:[#allocation10 + $0x68] sm:$0xff] %v456_v45 }
 0x1a9   :  { %v393_v46 = vpop.f32.mrf.mxu2 }
 0x1aa   :  { %v458_v47 = vpop.f32.mrf.mxu3  ;;  %v394_v48 = vadd.f32 %v735_v53, %v393_v46 }
 0x1ac   :  { %v459_v49 = vadd.f32 %v458_v47, %v394_v48 }
 0x1ae   :  { %478 = vst [vmem:[#allocation10 + $0x70] sm:$0xff] %v459_v49 }
 0x1b1   :  { %v396_v50 = vpop.f32.mrf.mxu2 }
 0x1b2   :  { %v461_v51 = vpop.f32.mrf.mxu3  ;;  %v397_v52 = vadd.f32 %v735_v53, %v396_v50 }
 0x1b4   :  { %v462_v54 = vadd.f32 %v461_v51, %v397_v52 }
 0x1b6   :  { %479 = vst [vmem:[#allocation10 + $0x78] sm:$0xff] %v462_v54 }
 0x1b7   :  { %492 = dma.vmem_to_hbm [thread:$0]  %s485_s15, 2048, %s487_s18, [#allocation4], %s643_s30, %s643_s30, %s644_s6  }
 0x1b8   :  { %637 = dma.done.wait [#allocation4], 2048  }
 0x1b9   :  { %638 = vsyncadd [#allocation4], 4294965248 }
 0x1ba   :  { %497 = vsyncpa [#allocation3], 1 }
 0x1bb   :  { %498 = vsyncpa [#allocation6], 1 }
 0x1bc   :  { %499 = vsyncpa [#allocation9], 1 }
 0x1bd   :  { %500 = vsyncpa [#allocation4], 1 }

</bundles_post_ra>
